<compile_context>
chip_gen: v7x
topology: tpu7x:2x2x1
jax: 0.10.0
libtpu: 0.0.40
codegen_flags: <defaults>
</compile_context>

<pallas_src>
import functools

import jax
import jax.numpy as jnp
from jax.experimental import pallas as pl
from jax.experimental.pallas import tpu as pltpu

_LANE = 128


def _round_up(x, m):
    return (x + m - 1) // m * m


def _qnet_kernel(x_ref, w1_ref, b1_ref, w2_ref, b2_ref, o_ref):
    # x: (Bt, in) f32, w1: (in, hidden) bf16, b1: (1, hidden) f32,
    # w2: (hidden, Npad) bf16, b2: (1, Npad) f32, o: (Bt, Npad) f32.
    x = x_ref[...].astype(jnp.bfloat16)                      # cast just before dot
    h = jnp.dot(x, w1_ref[...], preferred_element_type=jnp.float32)
    h = jnp.maximum(h + b1_ref[...], 0.0)                    # bias + ReLU in f32
    y = jnp.dot(h.astype(jnp.bfloat16), w2_ref[...],
                preferred_element_type=jnp.float32)
    o_ref[...] = (y + b2_ref[...]).astype(o_ref.dtype)       # lane-dense store


@functools.partial(jax.jit, static_argnames=("batch_tile",))
def _forward_2d(x, w1, b1, w2, b2, *, batch_tile=256):
    B, in_size = x.shape
    hidden = w1.shape[1]
    out_size = w2.shape[1]

    # Pad the output feature dim to a full lane width so output stores are
    # unmasked; the extra columns are zero and sliced off below.
    n_pad = _round_up(out_size, _LANE)
    w2p = jnp.zeros((hidden, n_pad), jnp.float32).at[:, :out_size].set(w2)
    b2p = jnp.zeros((1, n_pad), jnp.float32).at[:, :out_size].set(b2)

    # MXU wants bf16 inputs (f32 matmul is multi-pass emulation).
    w1b = w1.astype(jnp.bfloat16)
    w2b = w2p.astype(jnp.bfloat16)

    if B <= batch_tile:
        # Small batch: single invocation, no grid, everything resident in VMEM.
        out = pl.pallas_call(
            _qnet_kernel,
            out_shape=jax.ShapeDtypeStruct((B, n_pad), jnp.float32),
            in_specs=[pl.BlockSpec(memory_space=pltpu.MemorySpace.VMEM)] * 5,
            out_specs=pl.BlockSpec(memory_space=pltpu.MemorySpace.VMEM),
        )(x, w1b, b1, w2b, b2p)
        return out[:, :out_size]

    # Large batch: tile the batch axis, keep weights/biases resident.
    assert batch_tile % 8 == 0, "batch_tile must be a multiple of 8 (sublanes)"
    Bp = _round_up(B, batch_tile)
    xp = x if Bp == B else jnp.zeros((Bp, in_size), x.dtype).at[:B].set(x)
    out = pl.pallas_call(
        _qnet_kernel,
        out_shape=jax.ShapeDtypeStruct((Bp, n_pad), jnp.float32),
        grid=(Bp // batch_tile,),
        in_specs=[
            pl.BlockSpec((batch_tile, in_size), lambda i: (i, 0)),
            pl.BlockSpec((in_size, hidden), lambda i: (0, 0)),
            pl.BlockSpec((1, hidden), lambda i: (0, 0)),
            pl.BlockSpec((hidden, n_pad), lambda i: (0, 0)),
            pl.BlockSpec((1, n_pad), lambda i: (0, 0)),
        ],
        out_specs=pl.BlockSpec((batch_tile, n_pad), lambda i: (i, 0)),
        compiler_params=pltpu.CompilerParams(
            dimension_semantics=("parallel",)),  # shards across v7x's 2 TCs
    )(xp, w1b, b1, w2b, b2p)
    return out[:B, :out_size]


def linear_qnet_forward(x, w1, b1, w2, b2, *, batch_tile=256):
    """x: (B, input_size) or (input_size,) f32; returns matching-rank output."""
    if x.ndim == 1:  # single state vector, as in the snake agent's act() path
        return _forward_2d(x[None, :], w1, b1, w2, b2,
                           batch_tile=batch_tile)[0]
    return _forward_2d(x, w1, b1, w2, b2, batch_tile=batch_tile)


def init_params(key, input_size, hidden_size, output_size):
    # Mimics nn.Linear's U(-1/sqrt(fan_in), 1/sqrt(fan_in)) init, f32 storage.
    k1, k2, k3, k4 = jax.random.split(key, 4)
    bound1 = 1.0 / jnp.sqrt(input_size)
    bound2 = 1.0 / jnp.sqrt(hidden_size)
    w1 = jax.random.uniform(k1, (input_size, hidden_size), jnp.float32,
                            -bound1, bound1)
    b1 = jax.random.uniform(k2, (1, hidden_size), jnp.float32, -bound1, bound1)
    w2 = jax.random.uniform(k3, (hidden_size, output_size), jnp.float32,
                            -bound2, bound2)
    b2 = jax.random.uniform(k4, (1, output_size), jnp.float32, -bound2, bound2)
    return w1, b1, w2, b2


def _reference(x, w1, b1, w2, b2):
    # Mirrors the kernel's numerics (bf16 MXU inputs, f32 accumulation).
    h = jnp.dot(x.astype(jnp.bfloat16), w1.astype(jnp.bfloat16),
                preferred_element_type=jnp.float32) + b1
    h = jnp.maximum(h, 0.0)
    return jnp.dot(h.astype(jnp.bfloat16), w2.astype(jnp.bfloat16),
                   preferred_element_type=jnp.float32) + b2


if __name__ == "__main__":
    # Small shapes consistent with the module (snake Q-net style MLP).
    batch, input_size, hidden_size, output_size = 8, 16, 32, 4

    key = jax.random.PRNGKey(0)
    kx, kp = jax.random.split(key)
    x = jax.random.normal(kx, (batch, input_size), jnp.float32)
    w1, b1, w2, b2 = init_params(kp, input_size, hidden_size, output_size)

    # Small-batch (no-grid) path.
    out = linear_qnet_forward(x, w1, b1, w2, b2)
    jax.block_until_ready(out)
    assert out.shape == (batch, output_size)
    ref = _reference(x, w1, b1, w2, b2)
    assert jnp.allclose(out, ref, atol=1e-2, rtol=1e-2)
    # Loose check against pure-f32 PyTorch semantics as well.
    ref_f32 = jnp.maximum(x @ w1 + b1, 0.0) @ w2 + b2
    assert jnp.allclose(out, ref_f32, atol=1e-1, rtol=1e-1)

    # Single-state (1-D) path, as used at action-selection time.
    out1 = linear_qnet_forward(x[0], w1, b1, w2, b2)
    jax.block_until_ready(out1)
    assert out1.shape == (output_size,)
    assert jnp.allclose(out1, ref[0], atol=1e-2, rtol=1e-2)

    # Batch-tiled path (replay-buffer sized batch), parallel over batch tiles.
    big_batch = 1024
    xb = jax.random.normal(kx, (big_batch, input_size), jnp.float32)
    out_big = linear_qnet_forward(xb, w1, b1, w2, b2, batch_tile=256)
    jax.block_until_ready(out_big)
    assert out_big.shape == (big_batch, output_size)
    ref_big = _reference(xb, w1, b1, w2, b2)
    assert jnp.allclose(out_big, ref_big, atol=1e-2, rtol=1e-2)

    # TODO(synk): Linear_QNet.save() (torch.save checkpoint I/O) is host-side
    # and has no Pallas equivalent.
    print("KERNEL_OK")
</pallas_src>

<mosaic_0001>
module attributes {stable_mosaic.version = 11 : i64} {
  func.func @_qnet_kernel(%arg0: memref<8x16xf32, #tpu.memory_space<vmem>>, %arg1: memref<16x32xbf16, #tpu.memory_space<vmem>>, %arg2: memref<1x32xf32, #tpu.memory_space<vmem>>, %arg3: memref<32x128xbf16, #tpu.memory_space<vmem>>, %arg4: memref<1x128xf32, #tpu.memory_space<vmem>>, %arg5: memref<8x128xf32, #tpu.memory_space<vmem>>) attributes {dimension_semantics = [], scalar_prefetch = 0 : i64, scratch_operands = 0 : i64, tpu.core_type = #tpu.core_type<tc>} {
    %c0 = arith.constant 0 : index
    %c0_0 = arith.constant 0 : index
    %0 = vector.load %arg0[%c0, %c0_0] : memref<8x16xf32, #tpu.memory_space<vmem>>, vector<8x16xf32>
    %1 = arith.truncf %0 : vector<8x16xf32> to vector<8x16xbf16>
    %c0_1 = arith.constant 0 : index
    %c0_2 = arith.constant 0 : index
    %2 = vector.load %arg1[%c0_1, %c0_2] : memref<16x32xbf16, #tpu.memory_space<vmem>>, vector<16x32xbf16>
    %cst = arith.constant dense<0.000000e+00> : vector<8x32xf32>
    %3 = tpu.matmul %1, %2, %cst {dimension_numbers = #tpu.dot_dimension_numbers<[1], [0], [0], [1], [0, 0, 1, 1], [], []>} : vector<8x16xbf16>, vector<16x32xbf16>, vector<8x32xf32> -> vector<8x32xf32>
    %c0_3 = arith.constant 0 : index
    %c0_4 = arith.constant 0 : index
    %4 = vector.load %arg2[%c0_3, %c0_4] : memref<1x32xf32, #tpu.memory_space<vmem>>, vector<1x32xf32>
    %5 = vector.broadcast %4 : vector<1x32xf32> to vector<8x32xf32>
    %6 = arith.addf %3, %5 : vector<8x32xf32>
    %cst_5 = arith.constant 0.000000e+00 : f32
    %7 = vector.broadcast %cst_5 : f32 to vector<8x32xf32>
    %8 = arith.maximumf %6, %7 : vector<8x32xf32>
    %9 = arith.truncf %8 : vector<8x32xf32> to vector<8x32xbf16>
    %c0_6 = arith.constant 0 : index
    %c0_7 = arith.constant 0 : index
    %10 = vector.load %arg3[%c0_6, %c0_7] : memref<32x128xbf16, #tpu.memory_space<vmem>>, vector<32x128xbf16>
    %cst_8 = arith.constant dense<0.000000e+00> : vector<8x128xf32>
    %11 = tpu.matmul %9, %10, %cst_8 {dimension_numbers = #tpu.dot_dimension_numbers<[1], [0], [0], [1], [0, 0, 1, 1], [], []>} : vector<8x32xbf16>, vector<32x128xbf16>, vector<8x128xf32> -> vector<8x128xf32>
    %c0_9 = arith.constant 0 : index
    %c0_10 = arith.constant 0 : index
    %12 = vector.load %arg4[%c0_9, %c0_10] : memref<1x128xf32, #tpu.memory_space<vmem>>, vector<1x128xf32>
    %13 = vector.broadcast %12 : vector<1x128xf32> to vector<8x128xf32>
    %14 = arith.addf %11, %13 : vector<8x128xf32>
    %c0_11 = arith.constant 0 : index
    %c0_12 = arith.constant 0 : index
    %15 = vector.load %arg5[%c0_11, %c0_12] : memref<8x128xf32, #tpu.memory_space<vmem>>, vector<8x128xf32>
    tpu.vector_store %arg5[%c0_11, %c0_12], %14 {strides = array<i32>} : memref<8x128xf32, #tpu.memory_space<vmem>>, vector<8x128xf32>,
    return
  }
}

</mosaic_0001>

<bundles_post_ra>
// kernel: _forward_2d.1
= control target key start
LH: loop header
LB: loop body
LE: loop exit
PB: predicated region body
PF: predicated region fallthrough
CT: control target
= control target key end

     0   :  { %v187_v0 = vmov 0.0   ;;  %vm188_vm0 = vmmov 0   ;;  %vm38_vm1 = vcmask 130048   ;;  %vm107_vm2 = vcmask 261120   ;;  %s240_s1 = inlined_call_operand.vmem [shape: bf16[16,32], index: 1, kind: input, shape index: {}]   ;;  %s241_s0 = inlined_call_operand.vmem [shape: f32[8,16], index: 0, kind: input, shape index: {}]   ;;  %s242_s3 = inlined_call_operand.vmem [shape: bf16[32,128], index: 3, kind: input, shape index: {}]   ;;  %s243_s2 = inlined_call_operand.vmem [shape: f32[1,32], index: 2, kind: input, shape index: {}]   ;;  %s244_s4 = inlined_call_operand.vmem [shape: f32[1,128], index: 4, kind: input, shape index: {}]   ;;  %s245_s5 = inlined_call_operand.vmem [shape: f32[8,128], index: 5, kind: output, shape index: {}]  }
   0x1   :  { %168 = vmatprep.subr.bf16.mxu0 %v187_v0  ;;  %v184_v1 = vld [vmem:[%s240_s1] sm:$0xff]   ;;  %170 = vmatprep.mubr.msk.bf16.mxu0 %vm188_vm0, %v187_v0  ;;  %v186_v5 = vld [vmem:[%s242_s3 + $0x8] sm:$0xff]  }
   0x2   :  { %v21_v2 = vld [vmem:[%s241_s0] sm:$0xff]  ;;  %174 = vmatprep.subr.bf16.mxu1 %v187_v0  ;;  %178 = vmatprep.mubr.msk.bf16.mxu1 %vm188_vm0, %v187_v0 }
   0x3   :  { %169 = vmatpush3.bf16.msra.mxu0 %v184_v1  ;;  %v22_v3 = vpack.c.bf16 %v21_v2, %v21_v2  ;;  %v185_v4 = vld [vmem:[%s242_s3] sm:$0xff]  }
   0x4   :  { %175 = vmatpush3.bf16.msra.mxu1 %v185_v4  ;;  %v156_v6 = vld [vmem:[%s243_s2] ss:$0 sm:$0xff] }
   0x5   :  { %176 = vmatprep.subr.bf16.mxu1 %v187_v0  ;;  %v159_v14 = vld [vmem:[%s244_s4] ss:$0 sm:$0xff] }
   0x6   :  { %171 = vmatmul.mubr.msk.bf16.vlgmr.msra.gmra.mrb[0].mxu0 %vm38_vm1, %v22_v3 }
   0x8   :  { %177 = vmatpush3.bf16.msra.mxu1 %v186_v5 }
  0xd9   :  { %v76_v7 = vpop.f32.mrb[0].mxu0 }
  0xda   :  { %v77_v8 = vadd.f32 %v156_v6, %v76_v7  ;;  %v172_v9 = vpop.f32.mrb[1].mxu0 }
  0xdb   :  { %v79_v10 = vpop.f32.mrb[2].mxu0 }
  0xdc   :  { %v82_v11 = vmax.f32 %v77_v8, 0.0  ;;  %v173_v12 = vpop.f32.mrb[3].mxu0 }
  0xde   :  { %v83_v13 = vpack.c.bf16 %v82_v11, %v82_v11 }
  0xe0   :  { %179 = vmatmul.mubr.msk.bf16.vlgmr.msra.gmra.mrb[0].mxu1 %vm107_vm2, %v83_v13 }
 0x1b3   :  { %v145_v15 = vpop.f32.mrb[0].mxu1 }
 0x1b4   :  { %v146_v16 = vadd.f32 %v159_v14, %v145_v15  ;;  %v180_v17 = vpop.f32.mrb[1].mxu1 }
 0x1b5   :  { %v148_v18 = vpop.f32.mrb[2].mxu1 }
 0x1b6   :  { %151 = vst [vmem:[%s245_s5] sm:$0xff] %v146_v16  ;;  %v181_v19 = vpop.f32.mrb[3].mxu1 }

</bundles_post_ra>
